<compile_context>
chip_gen: v5e
topology: v5e:2x2
jax: 0.10.0
libtpu: 0.0.40
codegen_flags: <defaults>
</compile_context>

<pallas_src>
import jax
import jax.numpy as jnp
import numpy as np
from jax.experimental import pallas as pl
from jax.experimental.pallas import tpu as pltpu


def _round_up(n, m):
    return ((n + m - 1) // m) * m


# ----------------------------- Pallas kernel -------------------------------
def dfm_kernel(lin_ref, embf_ref, w1_ref, t1_ref, fmm_ref,
               w2_ref, t2_ref, wo_ref, c0_ref, out_ref):
    f32 = jnp.float32

    e_bf = embf_ref[...]                       # (TB, F*E) bf16, lane-dense
    e_f32 = e_bf.astype(f32)

    # Single MXU pass over the embedding tile:
    #   z[:, :H1]       = (emb @ W1) * bn_scale1   (scale folded into W1)
    #   z[:, H1:H1+E]   = per-dim field sums  sum_f e[:, f, :]  (0/1 columns)
    #   z[:, H1+E:]     = 0
    z = jnp.dot(e_bf, w1_ref[...], preferred_element_type=f32)     # (TB, H1p)

    # ---- FactorizationMachine (reduce_sum=True):
    #      0.5 * sum_e[(sum_f e)^2 - sum_f e^2]                    -> (TB, 1)
    square_of_sum = jnp.sum((z * z) * fmm_ref[...], axis=1, keepdims=True)
    sum_of_square = jnp.sum(e_f32 * e_f32, axis=1, keepdims=True)
    fm = 0.5 * (square_of_sum - sum_of_square)

    # ---- MultiLayerPerceptron (eval mode: BN folded into W / shift, ReLU,
    #      dropout = identity).  ReLU'd FM lanes are harmless: the matching
    #      rows of W2 are zero.  bf16 MXU inputs, f32 accumulation.
    h = jnp.maximum(z + t1_ref[...], 0.0)                          # (TB, H1p)
    h2 = jnp.dot(h.astype(jnp.bfloat16), w2_ref[...],
                 preferred_element_type=f32)                       # (TB, H2p)
    h2 = jnp.maximum(h2 + t2_ref[...], 0.0)
    # final Linear(H2 -> 1): VPU multiply + lane reduce, not an N=1 matmul
    mlp = jnp.sum(h2 * wo_ref[...], axis=1, keepdims=True)         # (TB, 1)

    total = fm + mlp                                               # (TB, 1)
    # lane-dense (1, TB) store; linear term & global bias added in row form
    out_ref[...] = jax.nn.sigmoid(jnp.transpose(total, (1, 0))
                                  + lin_ref[...] + c0_ref[0, 0])


# ----------------------------- Pallas wrapper --------------------------------
def dfm_forward_pallas(lin_sum, emb_flat_bf16, w1p, t1p, fm_mask,
                       w2p, t2p, wo_row, c0, *, tb=None):
    """lin_sum: (B,) f32; emb_flat_bf16: (B, F*E) bf16; weights padded/cast.

    Returns (B,) f32 == torch.sigmoid(x.squeeze(1)).
    """
    B, FE = emb_flat_bf16.shape

    # Batch tile: large (amortizes the ~0.35 us per-grid-step pipeline
    # overhead), lane-aligned, and chosen so the grid has >= 2 steps whenever
    # the batch allows it (v7x has 2 TensorCores on the "parallel" axis).
    if tb is None:
        tb = 4096 if B >= 16384 else 2048
    b128 = _round_up(B, 128)
    tb = max(128, min(_round_up(tb, 128), b128))
    if B > 128 and b128 // tb < 2:
        tb = _round_up(b128 // 2, 128)
    b_pad = _round_up(B, tb)
    grid = (b_pad // tb,)

    lin_row = lin_sum.reshape(1, B)
    if b_pad != B:
        lin_row = jnp.pad(lin_row, ((0, 0), (0, b_pad - B)))
        emb_flat_bf16 = jnp.pad(emb_flat_bf16, ((0, b_pad - B), (0, 0)))

    def _resident(shape):           # weights: constant index_map -> stay in VMEM
        nd = len(shape)
        return pl.BlockSpec(shape, lambda i, _nd=nd: (0,) * _nd)

    out = pl.pallas_call(
        dfm_kernel,
        out_shape=jax.ShapeDtypeStruct((1, b_pad), jnp.float32),
        grid_spec=pltpu.PrefetchScalarGridSpec(
            num_scalar_prefetch=0,
            grid=grid,
            in_specs=[
                pl.BlockSpec((1, tb), lambda i: (0, i)),     # linear-term row
                pl.BlockSpec((tb, FE), lambda i: (i, 0)),    # emb_flat (dominant)
                _resident(w1p.shape),                        # W1 | FM field-sum cols
                _resident(t1p.shape),
                _resident(fm_mask.shape),
                _resident(w2p.shape),
                _resident(t2p.shape),
                _resident(wo_row.shape),
                pl.BlockSpec(memory_space=pltpu.MemorySpace.SMEM),  # c0 scalar
            ],
            out_specs=pl.BlockSpec((1, tb), lambda i: (0, i)),
        ),
        compiler_params=pltpu.CompilerParams(
            dimension_semantics=("parallel",)),
    )(lin_row, emb_flat_bf16, w1p, t1p, fm_mask, w2p, t2p, wo_row, c0)
    return out[0, :B]


# --------------------------- Parameter setup --------------------------------
def init_params(key, field_dims, embed_dim, mlp_dims):
    total = int(np.sum(field_dims))
    embed_out = len(field_dims) * embed_dim
    ks = jax.random.split(key, 8)

    p = {}
    # FeaturesEmbedding / FeaturesLinear tables
    p["embed_w"] = 0.05 * jax.random.normal(ks[0], (total, embed_dim), jnp.float32)
    p["lin_w"] = 0.05 * jax.random.normal(ks[1], (total, 1), jnp.float32)
    p["lin_bias"] = jnp.zeros((1, 1), jnp.float32)

    # MLP: Linear -> BN -> ReLU -> Dropout, twice, then Linear(out=1)
    dims = [embed_out] + list(mlp_dims)
    for i in range(len(mlp_dims)):
        fan_in = dims[i]
        p[f"w{i+1}"] = jax.random.normal(ks[2 + i], (dims[i], dims[i + 1]),
                                         jnp.float32) / np.sqrt(fan_in)
        p[f"b{i+1}"] = jnp.zeros((dims[i + 1],), jnp.float32)
        # BatchNorm1d default init (eval mode): gamma=1, beta=0, mean=0, var=1
        p[f"gamma{i+1}"] = jnp.ones((dims[i + 1],), jnp.float32)
        p[f"beta{i+1}"] = jnp.zeros((dims[i + 1],), jnp.float32)
        p[f"mean{i+1}"] = jnp.zeros((dims[i + 1],), jnp.float32)
        p[f"var{i+1}"] = jnp.ones((dims[i + 1],), jnp.float32)
    p["wo"] = jax.random.normal(ks[6], (dims[-1], 1), jnp.float32) / np.sqrt(dims[-1])
    p["bo"] = jnp.zeros((1, 1), jnp.float32)
    return p


def fold_bn(weight_bias, gamma, beta, mean, var, eps=1e-5):
    """Fold Linear bias + eval-mode BatchNorm into (scale, shift)."""
    scale = gamma / jnp.sqrt(var + eps)
    shift = beta - mean * scale
    # z = h@W + b ; bn(z) = z*scale + shift = (h@(W*scale)) + (b*scale + shift)
    return scale[None, :], (weight_bias * scale + shift)[None, :]


def _pad2(a, rows, cols, fill=0.0):
    return jnp.pad(a, ((0, rows - a.shape[0]), (0, cols - a.shape[1])),
                   constant_values=fill)


# ------------------------------ Reference -----------------------------------
def dfm_forward_ref(x, p, field_dims, embed_dim, eps=1e-5):
    offsets = jnp.asarray(np.concatenate(([0], np.cumsum(field_dims)[:-1])),
                          jnp.int32)
    idx = x + offsets[None, :]
    emb = p["embed_w"][idx]                               # (B, F, E)
    lin = jnp.sum(p["lin_w"][idx][..., 0], axis=1, keepdims=True) + p["lin_bias"][0, 0]
    s = jnp.sum(emb, axis=1)
    fm = 0.5 * jnp.sum(s * s - jnp.sum(emb * emb, axis=1), axis=1, keepdims=True)
    h = emb.reshape(x.shape[0], -1)
    for i in (1, 2):
        z = h @ p[f"w{i}"] + p[f"b{i}"]
        z = (z - p[f"mean{i}"]) / jnp.sqrt(p[f"var{i}"] + eps) * p[f"gamma{i}"] + p[f"beta{i}"]
        h = jnp.maximum(z, 0.0)                           # dropout = identity (eval)
    mlp = h @ p["wo"] + p["bo"][0, 0]
    return jax.nn.sigmoid((lin + fm + mlp)[:, 0])


# -------------------------------- Main ---------------------------------------
if __name__ == "__main__":
    field_dims = (10, 20, 30, 40, 50, 60, 70, 80)   # 8 fields
    embed_dim = 16
    mlp_dims = (64, 32)
    dropout = 0.2                                    # inference mode -> identity
    B = 8

    key = jax.random.PRNGKey(0)
    k_param, k_x = jax.random.split(key)
    params = init_params(k_param, field_dims, embed_dim, mlp_dims)

    # integer feature indices, each within its own field's vocabulary
    maxvals = jnp.asarray(field_dims, jnp.int32)[None, :]
    x = (jax.random.randint(k_x, (B, len(field_dims)), 0, 1 << 30) % maxvals
         ).astype(jnp.int32)                          # (B, F) "long" input

    F = len(field_dims)
    E = embed_dim
    FE = F * E
    H1, H2 = mlp_dims
    # H1p must hold both the H1 MLP columns and the E packed FM field-sum columns
    H1p = _round_up(H1 + E, 128)
    H2p = _round_up(H2, 128)

    # --- glue: embedding gathers (plain JAX) ---
    offsets = jnp.asarray(np.concatenate(([0], np.cumsum(field_dims)[:-1])),
                          jnp.int32)
    idx = x + offsets[None, :]
    emb = params["embed_w"][idx]                      # (B, F, E)
    lin_sum = jnp.sum(params["lin_w"][idx][..., 0], axis=1)   # (B,) f32 (fuses w/ gather)
    emb_flat_bf = emb.reshape(B, -1).astype(jnp.bfloat16)     # dominant stream: bf16

    # --- glue: fold eval-mode BatchNorm into weights, pack FM field-sum matrix
    #     into W1's dead pad columns, pad hidden dims to 128, cast bf16 ---
    s1, t1 = fold_bn(params["b1"], params["gamma1"], params["beta1"],
                     params["mean1"], params["var1"])
    s2, t2 = fold_bn(params["b2"], params["gamma2"], params["beta2"],
                     params["mean2"], params["var2"])

    # W1 packed: cols [0, H1) = W1 * bn_scale1 ; cols [H1, H1+E) = 0/1 field-sum
    # matrix (left UNSCALED); remaining cols zero.
    fsum = jnp.asarray(np.tile(np.eye(E, dtype=np.float32), (F, 1)))  # (FE, E)
    w1_packed = jnp.zeros((FE, H1p), jnp.float32)
    w1_packed = w1_packed.at[:, :H1].set(params["w1"] * s1)
    w1_packed = w1_packed.at[:, H1:H1 + E].set(fsum)
    w1p = w1_packed.astype(jnp.bfloat16)                              # (FE, H1p)

    t1p = jnp.zeros((1, H1p), jnp.float32).at[:, :H1].set(t1)         # shift; 0 on FM lanes
    fm_mask = jnp.zeros((1, H1p), jnp.float32).at[:, H1:H1 + E].set(1.0)

    # W2 scaled by bn_scale2; rows >= H1 (incl. FM lanes) are zero pad.
    w2p = _pad2(params["w2"] * s2, H1p, H2p).astype(jnp.bfloat16)     # (H1p, H2p)
    t2p = _pad2(t2, 1, H2p, 0.0)
    wo_row = _pad2(params["wo"].T, 1, H2p, 0.0)                       # (1, H2p) f32
    c0 = params["lin_bias"] + params["bo"]                            # (1, 1) scalar

    out = dfm_forward_pallas(lin_sum, emb_flat_bf, w1p, t1p, fm_mask,
                             w2p, t2p, wo_row, c0)
    out = jax.block_until_ready(out)

    ref = dfm_forward_ref(x, params, field_dims, embed_dim)
    # bf16 embeddings/weights on the MXU path -> looser tolerance than pure f32
    np.testing.assert_allclose(np.asarray(out), np.asarray(ref),
                               rtol=2e-2, atol=2e-2)
    print("KERNEL_OK")
</pallas_src>

<mosaic_0001>
module attributes {stable_mosaic.version = 11 : i64} {
  func.func @dfm_kernel(%arg0: i32, %arg1: memref<1x128xf32, #tpu.memory_space<vmem>>, %arg2: memref<128x128xbf16, #tpu.memory_space<vmem>>, %arg3: memref<128x128xbf16, #tpu.memory_space<vmem>>, %arg4: memref<1x128xf32, #tpu.memory_space<vmem>>, %arg5: memref<1x128xf32, #tpu.memory_space<vmem>>, %arg6: memref<128x128xbf16, #tpu.memory_space<vmem>>, %arg7: memref<1x128xf32, #tpu.memory_space<vmem>>, %arg8: memref<1x128xf32, #tpu.memory_space<vmem>>, %arg9: memref<1x1xf32, #tpu.memory_space<smem>>, %arg10: memref<1x128xf32, #tpu.memory_space<vmem>>) attributes {dimension_semantics = [#tpu.dimension_semantics<parallel>], iteration_bounds = array<i64: 1>, scalar_prefetch = 0 : i64, scratch_operands = 0 : i64, tpu.core_type = #tpu.core_type<tc>, window_params = [{transform_indices = @transform_0, window_bounds = array<i64: 1, 128>}, {transform_indices = @transform_1, window_bounds = array<i64: 128, 128>}, {pipeline_mode = #tpu.pipeline_mode<synchronous>, transform_indices = @transform_2, window_bounds = array<i64: 128, 128>}, {pipeline_mode = #tpu.pipeline_mode<synchronous>, transform_indices = @transform_3, window_bounds = array<i64: 1, 128>}, {pipeline_mode = #tpu.pipeline_mode<synchronous>, transform_indices = @transform_4, window_bounds = array<i64: 1, 128>}, {pipeline_mode = #tpu.pipeline_mode<synchronous>, transform_indices = @transform_5, window_bounds = array<i64: 128, 128>}, {pipeline_mode = #tpu.pipeline_mode<synchronous>, transform_indices = @transform_6, window_bounds = array<i64: 1, 128>}, {pipeline_mode = #tpu.pipeline_mode<synchronous>, transform_indices = @transform_7, window_bounds = array<i64: 1, 128>}, {transform_indices = @transform_8, window_bounds = array<i64: 1, 1>}, {transform_indices = @transform_9, window_bounds = array<i64: 1, 128>}]} {
    %c0 = arith.constant 0 : index
    %c0_0 = arith.constant 0 : index
    %0 = vector.load %arg2[%c0, %c0_0] : memref<128x128xbf16, #tpu.memory_space<vmem>>, vector<128x128xbf16>
    %1 = arith.extf %0 : vector<128x128xbf16> to vector<128x128xf32>
    %c0_1 = arith.constant 0 : index
    %c0_2 = arith.constant 0 : index
    %2 = vector.load %arg3[%c0_1, %c0_2] : memref<128x128xbf16, #tpu.memory_space<vmem>>, vector<128x128xbf16>
    %cst = arith.constant dense<0.000000e+00> : vector<128x128xf32>
    %3 = tpu.matmul %0, %2, %cst {dimension_numbers = #tpu.dot_dimension_numbers<[1], [0], [0], [1], [0, 0, 1, 1], [], []>} : vector<128x128xbf16>, vector<128x128xbf16>, vector<128x128xf32> -> vector<128x128xf32>
    %4 = arith.mulf %3, %3 : vector<128x128xf32>
    %c0_3 = arith.constant 0 : index
    %c0_4 = arith.constant 0 : index
    %5 = vector.load %arg5[%c0_3, %c0_4] : memref<1x128xf32, #tpu.memory_space<vmem>>, vector<1x128xf32>
    %6 = vector.broadcast %5 : vector<1x128xf32> to vector<128x128xf32>
    %7 = arith.mulf %4, %6 : vector<128x128xf32>
    %cst_5 = arith.constant dense<0.000000e+00> : vector<128xf32>
    %8 = vector.multi_reduction <add>, %7, %cst_5 [1] : vector<128x128xf32> to vector<128xf32>
    %9 = vector.shape_cast %8 : vector<128xf32> to vector<128x1xf32>
    %10 = arith.mulf %1, %1 : vector<128x128xf32>
    %cst_6 = arith.constant dense<0.000000e+00> : vector<128xf32>
    %11 = vector.multi_reduction <add>, %10, %cst_6 [1] : vector<128x128xf32> to vector<128xf32>
    %12 = vector.shape_cast %11 : vector<128xf32> to vector<128x1xf32>
    %13 = arith.subf %9, %12 : vector<128x1xf32>
    %cst_7 = arith.constant 5.000000e-01 : f32
    %14 = vector.broadcast %cst_7 : f32 to vector<128x1xf32>
    %15 = arith.mulf %14, %13 : vector<128x1xf32>
    %c0_8 = arith.constant 0 : index
    %c0_9 = arith.constant 0 : index
    %16 = vector.load %arg4[%c0_8, %c0_9] : memref<1x128xf32, #tpu.memory_space<vmem>>, vector<1x128xf32>
    %17 = vector.broadcast %16 : vector<1x128xf32> to vector<128x128xf32>
    %18 = arith.addf %3, %17 : vector<128x128xf32>
    %cst_10 = arith.constant 0.000000e+00 : f32
    %19 = vector.broadcast %cst_10 : f32 to vector<128x128xf32>
    %20 = arith.maximumf %18, %19 : vector<128x128xf32>
    %21 = arith.truncf %20 : vector<128x128xf32> to vector<128x128xbf16>
    %c0_11 = arith.constant 0 : index
    %c0_12 = arith.constant 0 : index
    %22 = vector.load %arg6[%c0_11, %c0_12] : memref<128x128xbf16, #tpu.memory_space<vmem>>, vector<128x128xbf16>
    %cst_13 = arith.constant dense<0.000000e+00> : vector<128x128xf32>
    %23 = tpu.matmul %21, %22, %cst_13 {dimension_numbers = #tpu.dot_dimension_numbers<[1], [0], [0], [1], [0, 0, 1, 1], [], []>} : vector<128x128xbf16>, vector<128x128xbf16>, vector<128x128xf32> -> vector<128x128xf32>
    %c0_14 = arith.constant 0 : index
    %c0_15 = arith.constant 0 : index
    %24 = vector.load %arg7[%c0_14, %c0_15] : memref<1x128xf32, #tpu.memory_space<vmem>>, vector<1x128xf32>
    %25 = vector.broadcast %24 : vector<1x128xf32> to vector<128x128xf32>
    %26 = arith.addf %23, %25 : vector<128x128xf32>
    %cst_16 = arith.constant 0.000000e+00 : f32
    %27 = vector.broadcast %cst_16 : f32 to vector<128x128xf32>
    %28 = arith.maximumf %26, %27 : vector<128x128xf32>
    %c0_17 = arith.constant 0 : index
    %c0_18 = arith.constant 0 : index
    %29 = vector.load %arg8[%c0_17, %c0_18] : memref<1x128xf32, #tpu.memory_space<vmem>>, vector<1x128xf32>
    %30 = vector.broadcast %29 : vector<1x128xf32> to vector<128x128xf32>
    %31 = arith.mulf %28, %30 : vector<128x128xf32>
    %cst_19 = arith.constant dense<0.000000e+00> : vector<128xf32>
    %32 = vector.multi_reduction <add>, %31, %cst_19 [1] : vector<128x128xf32> to vector<128xf32>
    %33 = vector.shape_cast %32 : vector<128xf32> to vector<128x1xf32>
    %34 = arith.addf %15, %33 : vector<128x1xf32>
    %35 = tpu.transpose %34, [1, 0] : vector<128x1xf32> -> vector<1x128xf32>
    %c0_20 = arith.constant 0 : index
    %c0_21 = arith.constant 0 : index
    %36 = vector.load %arg1[%c0_20, %c0_21] : memref<1x128xf32, #tpu.memory_space<vmem>>, vector<1x128xf32>
    %37 = arith.addf %35, %36 : vector<1x128xf32>
    %c0_22 = arith.constant 0 : index
    %c0_23 = arith.constant 0 : index
    %38 = memref.load %arg9[%c0_22, %c0_23] : memref<1x1xf32, #tpu.memory_space<smem>>
    %39 = vector.broadcast %38 : f32 to vector<1x128xf32>
    %40 = arith.addf %37, %39 : vector<1x128xf32>
    %41 = arith.negf %40 : vector<1x128xf32>
    %42 = math.exp %41 : vector<1x128xf32>
    %cst_24 = arith.constant 1.000000e+00 : f32
    %43 = vector.broadcast %cst_24 : f32 to vector<1x128xf32>
    %44 = arith.addf %43, %42 : vector<1x128xf32>
    %45 = arith.divf %43, %44 : vector<1x128xf32>
    %c0_25 = arith.constant 0 : index
    %c0_26 = arith.constant 0 : index
    %46 = vector.load %arg10[%c0_25, %c0_26] : memref<1x128xf32, #tpu.memory_space<vmem>>, vector<1x128xf32>
    tpu.vector_store %arg10[%c0_25, %c0_26], %45 {strides = array<i32>} : memref<1x128xf32, #tpu.memory_space<vmem>>, vector<1x128xf32>,
    return
  }
  func.func @transform_0(%arg0: i32) -> (i32, i32) {
    %c0_i32 = arith.constant 0 : i32
    %c0_i32_0 = arith.constant 0 : i32
    return %c0_i32, %arg0 : i32, i32
  }
  func.func @transform_1(%arg0: i32) -> (i32, i32) {
    %c0_i32 = arith.constant 0 : i32
    %c0_i32_0 = arith.constant 0 : i32
    return %arg0, %c0_i32 : i32, i32
  }
  func.func @transform_2(%arg0: i32) -> (i32, i32) {
    %c0_i32 = arith.constant 0 : i32
    %c0_i32_0 = arith.constant 0 : i32
    %c0_i32_1 = arith.constant 0 : i32
    return %c0_i32, %c0_i32_0 : i32, i32
  }
  func.func @transform_3(%arg0: i32) -> (i32, i32) {
    %c0_i32 = arith.constant 0 : i32
    %c0_i32_0 = arith.constant 0 : i32
    %c0_i32_1 = arith.constant 0 : i32
    return %c0_i32, %c0_i32_0 : i32, i32
  }
  func.func @transform_4(%arg0: i32) -> (i32, i32) {
    %c0_i32 = arith.constant 0 : i32
    %c0_i32_0 = arith.constant 0 : i32
    %c0_i32_1 = arith.constant 0 : i32
    return %c0_i32, %c0_i32_0 : i32, i32
  }
  func.func @transform_5(%arg0: i32) -> (i32, i32) {
    %c0_i32 = arith.constant 0 : i32
    %c0_i32_0 = arith.constant 0 : i32
    %c0_i32_1 = arith.constant 0 : i32
    return %c0_i32, %c0_i32_0 : i32, i32
  }
  func.func @transform_6(%arg0: i32) -> (i32, i32) {
    %c0_i32 = arith.constant 0 : i32
    %c0_i32_0 = arith.constant 0 : i32
    %c0_i32_1 = arith.constant 0 : i32
    return %c0_i32, %c0_i32_0 : i32, i32
  }
  func.func @transform_7(%arg0: i32) -> (i32, i32) {
    %c0_i32 = arith.constant 0 : i32
    %c0_i32_0 = arith.constant 0 : i32
    %c0_i32_1 = arith.constant 0 : i32
    return %c0_i32, %c0_i32_0 : i32, i32
  }
  func.func @transform_8(%arg0: i32) -> (i32, i32) {
    %c0_i32 = arith.constant 0 : i32
    %c0_i32_0 = arith.constant 0 : i32
    %c0_i32_1 = arith.constant 0 : i32
    return %c0_i32, %c0_i32_0 : i32, i32
  }
  func.func @transform_9(%arg0: i32) -> (i32, i32) {
    %c0_i32 = arith.constant 0 : i32
    %c0_i32_0 = arith.constant 0 : i32
    return %c0_i32, %arg0 : i32, i32
  }
}

</mosaic_0001>

<bundles_post_ra>
// kernel: tpu_custom_call.1
= control target key start
LH: loop header
LB: loop body
LE: loop exit
PB: predicated region body
PF: predicated region fallthrough
CT: control target
= control target key end

     0   :  { %15 = vsyncpa [#allocation4], 0  ;;  %s1228_s0 = inlined_call_operand.vmem [shape: f32[1,128], index: 0, kind: input, shape index: {}]   ;;  %s1229_s1 = inlined_call_operand.hbm [shape: bf16[128,128], index: 1, kind: input, shape index: {}]   ;;  %s1230_s2 = inlined_call_operand.hbm [shape: bf16[128,128], index: 2, kind: input, shape index: {}]   ;;  %s1231_s3 = inlined_call_operand.vmem [shape: f32[1,128], index: 3, kind: input, shape index: {}]   ;;  %s1232_s4 = inlined_call_operand.vmem [shape: f32[1,128], index: 4, kind: input, shape index: {}]   ;;  %s1233_s5 = inlined_call_operand.hbm [shape: bf16[128,128], index: 5, kind: input, shape index: {}]   ;;  %s1234_s6 = inlined_call_operand.vmem [shape: f32[1,128], index: 6, kind: input, shape index: {}]   ;;  %s1235_s7 = inlined_call_operand.vmem [shape: f32[1,128], index: 7, kind: input, shape index: {}]   ;;  %s1236_s8 = inlined_call_operand.<no memory space> [shape: f32[1,1], index: 8, kind: input, shape index: {}]   ;;  %s1237_s9 = inlined_call_operand.hbm [shape: f32[1,128], index: 9, kind: output, shape index: {}]  }
   0x1   :  { %16 = vsyncpa [#allocation7], 0 }
   0x2   :  { %17 = vsyncpa [#allocation5], 0  ;;  %s37_s11 = sshll.u32 %s1230_s2, 4  ;;  %s995_s12 = smov [#allocation6]   ;;  %s38_s11 = int_to_ptr.hbm [resolvable:$true] %s37_s11 }
   0x3   :  { %s39_s13 = sshll.u32 %s995_s12, 4  ;;  %s24_s16 = sshll.u32 %s1229_s1, 4  ;;  %s40_s13 = int_to_ptr.vmem [resolvable:$true] %s39_s13  ;;  %s25_s16 = int_to_ptr.hbm [resolvable:$true] %s24_s16 }
   0x4   :  { %s996_s17 = smov 64   ;;  %s997_s18 = smov 4  }
   0x5   :  { %45 = dma.hbm_to_vmem [thread:$0]  %s38_s11, 1024, %s40_s13, [#allocation7], %s996_s17, %s996_s17, %s997_s18  }
   0x6   :  { %s998_s19 = smov [#allocation3]   ;;  %s54_s23 = sshll.u32 %s1233_s5, 4  ;;  %s55_s23 = int_to_ptr.hbm [resolvable:$true] %s54_s23 }
   0x7   :  { %s26_s20 = sshll.u32 %s998_s19, 4  ;;  %s999_s2 = smov [#allocation8]   ;;  %s27_s20 = int_to_ptr.vmem [resolvable:$true] %s26_s20 }
   0x8   :  { %32 = dma.hbm_to_vmem [thread:$0]  %s25_s16, 1024, %s27_s20, [#allocation4], %s996_s17, %s996_s17, %s997_s18  }
   0x9   :  { %s56_s24 = sshll.u32 %s999_s2, 4  ;;  %s57_s24 = int_to_ptr.vmem [resolvable:$true] %s56_s24 }
   0xa   :  { %62 = dma.hbm_to_vmem [thread:$0]  %s55_s23, 1024, %s57_s24, [#allocation7], %s996_s17, %s996_s17, %s997_s18  }
   0xb   :  { %989 = dma.done.wait [#allocation4], 1024  }
   0xc   :  { %990 = vsyncadd [#allocation4], 4294966272 }
   0xd   :  { %991 = dma.done.wait [#allocation7], 2048  }
   0xe   :  { %992 = vsyncadd [#allocation7], 4294965248  ;;  %v854_v0 = vld [vmem:[#allocation6 + $0x38] sm:$0xff]  ;;  %v853_v1 = vld [vmem:[#allocation6 + $0x30] sm:$0xff] }
   0xf   :  { %225 = vmatpush.bf16.msra.mxu0 %v854_v0  ;;  %863 = vmatpush.bf16.msra.mxu2 %v854_v0  ;;  %v852_v2 = vld [vmem:[#allocation6 + $0x28] sm:$0xff]  ;;  %v851_v3 = vld [vmem:[#allocation6 + $0x20] sm:$0xff]  ;;  %v850_v4 = vld [vmem:[#allocation6 + $0x18] sm:$0xff] }
  0x10   :  { %v849_v5 = vld [vmem:[#allocation6 + $0x10] sm:$0xff]  ;;  %v848_v6 = vld [vmem:[#allocation6 + $0x8] sm:$0xff]  ;;  %v847_v7 = vld [vmem:[#allocation6] sm:$0xff] }
  0x11   :  { %v839_v8 = vld [vmem:[#allocation3] sm:$0xff]  ;;  %v840_v10 = vld [vmem:[#allocation3 + $0x8] sm:$0xff]  ;;  %v862_v13 = vld [vmem:[#allocation8 + $0x38] sm:$0xff] }
  0x12   :  { %v843_v9 = vld [vmem:[#allocation3 + $0x20] sm:$0xff]  ;;  %v844_v11 = vld [vmem:[#allocation3 + $0x28] sm:$0xff]  ;;  %534 = vmatpush.bf16.msra.mxu1 %v862_v13  ;;  %v85_v17 = vld [vmem:[#allocation3 + $0x10] sm:$0xff]   ;;  %871 = vmatpush.bf16.msra.mxu3 %v862_v13 }
  0x13   :  { %226 = vmatpush.bf16.msra.mxu0 %v853_v1  ;;  %864 = vmatpush.bf16.msra.mxu2 %v853_v1  ;;  %v82_v12 = vld [vmem:[#allocation3 + $0x4] sm:$0xff]   ;;  %v81_v16 = vld [vmem:[#allocation3] sm:$0xf]  ;;  %v861_v19 = vld [vmem:[#allocation8 + $0x30] sm:$0xff]  ;;  %v101_v24 = vunpack.c.l.bf16 %v85_v17  ;;  %v102_v25 = vunpack.c.h.bf16 %v85_v17 }
  0x14   :  { %v98_v14 = vunpack.c.l.bf16 %v82_v12  ;;  %v99_v15 = vunpack.c.h.bf16 %v82_v12  ;;  %v97_v18 = vunpack.c.l.bf16 %v81_v16  ;;  %v84_v22 = vld [vmem:[#allocation3 + $0xc] sm:$0xf]  ;;  %v88_v30 = vld [vmem:[#allocation3 + $0x1c] sm:$0xff]   ;;  %v90_v33 = vld [vmem:[#allocation3 + $0x24] sm:$0xff]  }
  0x15   :  { %v860_v26 = vld [vmem:[#allocation8 + $0x28] sm:$0xff]  ;;  %v100_v27 = vunpack.c.l.bf16 %v84_v22  ;;  %v346_v28 = vmul.f32 %v101_v24, %v101_v24  ;;  %v347_v29 = vmul.f32 %v102_v25, %v102_v25  ;;  %v859_v32 = vld [vmem:[#allocation8 + $0x20] sm:$0xff]  ;;  %v841_v34 = vld [vmem:[#allocation3 + $0x10] sm:$0xff]  ;;  %v104_v36 = vunpack.c.l.bf16 %v88_v30 }
  0x16   :  { %v343_v20 = vmul.f32 %v98_v14, %v98_v14  ;;  %v344_v21 = vmul.f32 %v99_v15, %v99_v15  ;;  %v342_v23 = vmul.f32 %v97_v18, %v97_v18  ;;  %535 = vmatpush.bf16.msra.mxu1 %v861_v19  ;;  %872 = vmatpush.bf16.msra.mxu3 %v861_v19  ;;  %v845_v35 = vld [vmem:[#allocation3 + $0x30] sm:$0xff]  ;;  %v106_v37 = vunpack.c.l.bf16 %v90_v33  ;;  %v842_v40 = vld [vmem:[#allocation3 + $0x18] sm:$0xff]  ;;  %v856_v49 = vld [vmem:[#allocation8 + $0x8] sm:$0xff] }
  0x17   :  { %227 = vmatpush.bf16.msra.mxu0 %v852_v2  ;;  %865 = vmatpush.bf16.msra.mxu2 %v852_v2  ;;  %v345_v31 = vmul.f32 %v100_v27, %v100_v27  ;;  %v349_v38 = vmul.f32 %v104_v36, %v104_v36  ;;  %v846_v41 = vld [vmem:[#allocation3 + $0x38] sm:$0xff]  ;;  %v107_v44 = vunpack.c.h.bf16 %v90_v33  ;;  %v857_v48 = vld [vmem:[#allocation8 + $0x10] sm:$0xff]  ;;  %v105_v50 = vunpack.c.h.bf16 %v88_v30  ;;  %v855_v52 = vld [vmem:[#allocation8] sm:$0xff] }
  0x18   :  { %360 = vadd.xlane.f32.xlu2 %v343_v20  ;;  %362 = vadd.xlane.f32.xlu0 %v344_v21  ;;  %v351_v39 = vmul.f32 %v106_v37, %v106_v37  ;;  %v858_v42 = vld [vmem:[#allocation8 + $0x18] sm:$0xff]  ;;  %v1063_v53 = vld [vmem:[%s1232_s4] ss:$0 sm:$0xff] }
  0x19   :  { %358 = vadd.xlane.f32.xlu1 %v342_v23  ;;  %v87_v43 = vld [vmem:[#allocation3 + $0x18] sm:$0xf]  ;;  %v352_v46 = vmul.f32 %v107_v44, %v107_v44  ;;  %v350_v51 = vmul.f32 %v105_v50, %v105_v50  ;;  %v1068_v56 = vld [vmem:[%s1231_s3] ss:$0 sm:$0xff] }
  0x1a   :  { %536 = vmatpush.bf16.msra.mxu1 %v860_v26  ;;  %873 = vmatpush.bf16.msra.mxu3 %v860_v26  ;;  %v103_v45 = vunpack.c.l.bf16 %v87_v43 }
  0x1b   :  { %228 = vmatpush.bf16.msra.mxu0 %v851_v3  ;;  %866 = vmatpush.bf16.msra.mxu2 %v851_v3 }
  0x1c   :  { %v348_v47 = vmul.f32 %v103_v45, %v103_v45 }
  0x1e   :  { %537 = vmatpush.bf16.msra.mxu1 %v859_v32  ;;  %874 = vmatpush.bf16.msra.mxu3 %v859_v32 }
  0x1f   :  { %229 = vmatpush.bf16.msra.mxu0 %v850_v4  ;;  %867 = vmatpush.bf16.msra.mxu2 %v850_v4 }
  0x20   :  { %366 = vadd.xlane.f32.xlu2 %v346_v28  ;;  %368 = vadd.xlane.f32.xlu0 %v347_v29 }
  0x21   :  { %364 = vadd.xlane.f32.xlu1 %v345_v31 }
  0x22   :  { %538 = vmatpush.bf16.msra.mxu1 %v858_v42  ;;  %875 = vmatpush.bf16.msra.mxu3 %v858_v42 }
  0x23   :  { %230 = vmatpush.bf16.msra.mxu0 %v849_v5  ;;  %868 = vmatpush.bf16.msra.mxu2 %v849_v5 }
  0x26   :  { %539 = vmatpush.bf16.msra.mxu1 %v857_v48  ;;  %876 = vmatpush.bf16.msra.mxu3 %v857_v48 }
  0x27   :  { %231 = vmatpush.bf16.msra.mxu0 %v848_v6  ;;  %869 = vmatpush.bf16.msra.mxu2 %v848_v6 }
  0x28   :  { %372 = vadd.xlane.f32.xlu2 %v349_v38  ;;  %376 = vadd.xlane.f32.xlu0 %v351_v39 }
  0x29   :  { %370 = vadd.xlane.f32.xlu1 %v348_v47 }
  0x2a   :  { %540 = vmatpush.bf16.msra.mxu1 %v856_v49  ;;  %877 = vmatpush.bf16.msra.mxu3 %v856_v49 }
  0x2b   :  { %232 = vmatpush.bf16.msra.mxu0 %v847_v7  ;;  %870 = vmatpush.bf16.msra.mxu2 %v847_v7 }
  0x2e   :  { %233 = vmatmul.bf16.vlgmr.msra.gmra.mxu0 %v839_v8  ;;  %253 = vmatmul.bf16.vlgmr.msra.gmra.mxu2 %v843_v9 }
  0x2f   :  { %541 = vmatpush.bf16.msra.mxu1 %v855_v52  ;;  %878 = vmatpush.bf16.msra.mxu3 %v855_v52 }
  0x30   :  { %378 = vadd.xlane.f32.xlu2 %v352_v46 }
  0x31   :  { %374 = vadd.xlane.f32.xlu1 %v350_v51 }
  0x3e   :  { %238 = vmatmul.bf16.gmra.mxu0 %v840_v10  ;;  %258 = vmatmul.bf16.gmra.mxu2 %v844_v11 }
  0x4e   :  { %243 = vmatmul.bf16.gmra.mxu0 %v841_v34  ;;  %263 = vmatmul.bf16.gmra.mxu2 %v845_v35 }
  0x5e   :  { %248 = vmatmul.bf16.gmra.mxu0 %v842_v40  ;;  %268 = vmatmul.bf16.gmra.mxu2 %v846_v41 }
  0xab   :  { %v234_v54 = vpop.f32.mrf.mxu0 }
  0xac   :  { %v274_v55 = vmul.f32 %v234_v54, %v234_v54  ;;  %v426_v59 = vadd.f32 %v1068_v56, %v234_v54 }
  0xae   :  { %v294_v57 = vmul.f32 %v1063_v53, %v274_v55  ;;  %v442_v1 = vmax.f32 %v426_v59, 0.0 }
  0xb0   :  { %310 = vadd.xlane.f32.xlu0 %v294_v57 }
  0xb1   :  { %v254_v58 = vpop.f32.mrf.mxu2 }
  0xb2   :  { %v282_v60 = vmul.f32 %v254_v58, %v254_v58  ;;  %v434_v4 = vadd.f32 %v1068_v56, %v254_v58 }
  0xb3   :  { %v236_v61 = vpop.f32.mrf.mxu0 }
  0xb4   :  { %v275_v62 = vmul.f32 %v236_v61, %v236_v61  ;;  %v427_v63 = vadd.f32 %v1068_v56, %v236_v61  ;;  %v302_v0 = vmul.f32 %v1063_v53, %v282_v60  ;;  %v450_v10 = vmax.f32 %v434_v4, 0.0 }
  0xb6   :  { %v443_v2 = vmax.f32 %v427_v63, 0.0  ;;  %326 = vadd.xlane.f32.xlu2 %v302_v0  ;;  %v295_v3 = vmul.f32 %v1063_v53, %v275_v62 }
  0xb8   :  { %312 = vadd.xlane.f32.xlu0 %v295_v3  ;;  %v458_v5 = vpack.c.bf16 %v443_v2, %v442_v1 }
  0xb9   :  { %v256_v6 = vpop.f32.mrf.mxu2 }
  0xba   :  { %v283_v7 = vmul.f32 %v256_v6, %v256_v6  ;;  %v435_v8 = vadd.f32 %v1068_v56, %v256_v6  ;;  %542 = vmatmul.bf16.vlgmr.msra.gmra.mxu1 %v458_v5 }
  0xbb   :  { %v239_v9 = vpop.f32.mrf.mxu0 }
  0xbc   :  { %v451_v11 = vmax.f32 %v435_v8, 0.0  ;;  %v276_v12 = vmul.f32 %v239_v9, %v239_v9  ;;  %v303_v14 = vmul.f32 %v1063_v53, %v283_v7  ;;  %v428_v17 = vadd.f32 %v1068_v56, %v239_v9 }
  0xbe   :  { %v462_v13 = vpack.c.bf16 %v451_v11, %v450_v10  ;;  %v296_v15 = vmul.f32 %v1063_v53, %v276_v12  ;;  %v444_v22 = vmax.f32 %v428_v17, 0.0  ;;  %v1102_v17 = vpop.xlane.xlu2 %360 }
  0xc0   :  { %562 = vmatmul.bf16.vlgmr.msra.gmra.mxu3 %v462_v13  ;;  %328 = vadd.xlane.f32.xlu0 %v303_v14 }
  0xc1   :  { %314 = vadd.xlane.f32.xlu1 %v296_v15  ;;  %v259_v16 = vpop.f32.mrf.mxu2 }
  0xc2   :  { %v284_v18 = vmul.f32 %v259_v16, %v259_v16  ;;  %v436_v23 = vadd.f32 %v1068_v56, %v259_v16 }
  0xc3   :  { %v241_v19 = vpop.f32.mrf.mxu0 }
  0xc4   :  { %v429_v20 = vadd.f32 %v1068_v56, %v241_v19  ;;  %v304_v21 = vmul.f32 %v1063_v53, %v284_v18  ;;  %v452_v27 = vmax.f32 %v436_v23, 0.0  ;;  %v277_v30 = vmul.f32 %v241_v19, %v241_v19  ;;  %v1104_v18 = vpop.xlane.xlu0 %362  ;;  %v1106_v19 = vpop.xlane.xlu1 %358 }
  0xc6   :  { %v445_v24 = vmax.f32 %v429_v20, 0.0  ;;  %v297_v35 = vmul.f32 %v1063_v53, %v277_v30  ;;  %v1108_v20 = vpop.xlane.xlu2 %366 }
  0xc8   :  { %v459_v25 = vpack.c.bf16 %v445_v24, %v444_v22 }
  0xc9   :  { %330 = vadd.xlane.f32.xlu1 %v304_v21  ;;  %v261_v26 = vpop.f32.mrf.mxu2 }
  0xca   :  { %v285_v28 = vmul.f32 %v261_v26, %v261_v26  ;;  %v437_v29 = vadd.f32 %v1068_v56, %v261_v26  ;;  %547 = vmatmul.bf16.gmra.mxu1 %v459_v25 }
  0xcb   :  { %v244_v31 = vpop.f32.mrf.mxu0 }
  0xcc   :  { %v453_v32 = vmax.f32 %v437_v29, 0.0  ;;  %v305_v33 = vmul.f32 %v1063_v53, %v285_v28  ;;  %v278_v36 = vmul.f32 %v244_v31, %v244_v31  ;;  %v430_v38 = vadd.f32 %v1068_v56, %v244_v31  ;;  %v1110_v21 = vpop.xlane.xlu0 %368  ;;  %v1112_v22 = vpop.xlane.xlu1 %364 }
  0xce   :  { %332 = vadd.xlane.f32.xlu2 %v305_v33  ;;  %v463_v34 = vpack.c.bf16 %v453_v32, %v452_v27  ;;  %v298_v42 = vmul.f32 %v1063_v53, %v278_v36  ;;  %v446_v44 = vmax.f32 %v430_v38, 0.0  ;;  %v1114_v23 = vpop.xlane.xlu2 %372  ;;  %v1141_v33 = vld [vmem:[%s1234_s6] ss:$0 sm:$0xff] }
  0xcf   :  { %v1147_v36 = vld [vmem:[%s1235_s7] ss:$0 sm:$0xff] }
  0xd0   :  { %567 = vmatmul.bf16.gmra.mxu3 %v463_v34 }
  0xd1   :  { %316 = vadd.xlane.f32.xlu1 %v297_v35  ;;  %v264_v37 = vpop.f32.mrf.mxu2 }
  0xd2   :  { %v286_v39 = vmul.f32 %v264_v37, %v264_v37  ;;  %v438_v46 = vadd.f32 %v1068_v56, %v264_v37 }
  0xd3   :  { %v246_v40 = vpop.f32.mrf.mxu0 }
  0xd4   :  { %v431_v41 = vadd.f32 %v1068_v56, %v246_v40  ;;  %v306_v43 = vmul.f32 %v1063_v53, %v286_v39  ;;  %v279_v47 = vmul.f32 %v246_v40, %v246_v40  ;;  %v454_v50 = vmax.f32 %v438_v46, 0.0 }
  0xd6   :  { %v447_v45 = vmax.f32 %v431_v41, 0.0  ;;  %318 = vadd.xlane.f32.xlu2 %v298_v42  ;;  %334 = vadd.xlane.f32.xlu0 %v306_v43  ;;  %v299_v58 = vmul.f32 %v1063_v53, %v279_v47  ;;  %v1120_v24 = vpop.xlane.xlu2 %378 }
  0xd8   :  { %v460_v48 = vpack.c.bf16 %v447_v45, %v446_v44 }
  0xd9   :  { %v266_v49 = vpop.f32.mrf.mxu2 }
  0xda   :  { %552 = vmatmul.bf16.gmra.mxu1 %v460_v48  ;;  %v287_v51 = vmul.f32 %v266_v49, %v266_v49  ;;  %v439_v52 = vadd.f32 %v1068_v56, %v266_v49 }
  0xdb   :  { %v249_v54 = vpop.f32.mrf.mxu0 }
  0xdc   :  { %v280_v55 = vmul.f32 %v249_v54, %v249_v54  ;;  %v455_v57 = vmax.f32 %v439_v52, 0.0  ;;  %v307_v59 = vmul.f32 %v1063_v53, %v287_v51  ;;  %v432_v63 = vadd.f32 %v1068_v56, %v249_v54 }
  0xde   :  { %320 = vadd.xlane.f32.xlu2 %v299_v58  ;;  %336 = vadd.xlane.f32.xlu1 %v307_v59  ;;  %v300_v60 = vmul.f32 %v1063_v53, %v280_v55  ;;  %v464_v61 = vpack.c.bf16 %v455_v57, %v454_v50  ;;  %v448_v5 = vmax.f32 %v432_v63, 0.0 }
  0xe0   :  { %322 = vadd.xlane.f32.xlu0 %v300_v60  ;;  %572 = vmatmul.bf16.gmra.mxu3 %v464_v61 }
  0xe1   :  { %v269_v62 = vpop.f32.mrf.mxu2 }
  0xe2   :  { %v288_v0 = vmul.f32 %v269_v62, %v269_v62  ;;  %v440_v8 = vadd.f32 %v1068_v56, %v269_v62 }
  0xe3   :  { %v251_v1 = vpop.f32.mrf.mxu0 }
  0xe4   :  { %v281_v2 = vmul.f32 %v251_v1, %v251_v1  ;;  %v433_v3 = vadd.f32 %v1068_v56, %v251_v1  ;;  %v308_v4 = vmul.f32 %v1063_v53, %v288_v0  ;;  %v456_v11 = vmax.f32 %v440_v8, 0.0 }
  0xe6   :  { %v449_v6 = vmax.f32 %v433_v3, 0.0  ;;  %v301_v7 = vmul.f32 %v1063_v53, %v281_v2  ;;  %338 = vadd.xlane.f32.xlu2 %v308_v4 }
  0xe8   :  { %324 = vadd.xlane.f32.xlu1 %v301_v7  ;;  %v461_v9 = vpack.c.bf16 %v449_v6, %v448_v5  ;;  %v93_v7 = vld [vmem:[#allocation3 + $0x30] sm:$0xff]  }
  0xe9   :  { %v271_v10 = vpop.f32.mrf.mxu2 }
  0xea   :  { %557 = vmatmul.bf16.gmra.mxu1 %v461_v9  ;;  %v289_v12 = vmul.f32 %v271_v10, %v271_v10  ;;  %v441_v13 = vadd.f32 %v1068_v56, %v271_v10  ;;  %v1116_v56 = vpop.xlane.xlu0 %376  ;;  %v109_v9 = vunpack.c.l.bf16 %v93_v7 }
  0xec   :  { %v457_v14 = vmax.f32 %v441_v13, 0.0  ;;  %v309_v15 = vmul.f32 %v1063_v53, %v289_v12  ;;  %v1118_v53 = vpop.xlane.xlu1 %370  ;;  %v354_v13 = vmul.f32 %v109_v9, %v109_v9 }
  0xee   :  { %v465_v16 = vpack.c.bf16 %v457_v14, %v456_v11  ;;  %340 = vadd.xlane.f32.xlu0 %v309_v15  ;;  %v92_v14 = vld [vmem:[#allocation3 + $0x2c] sm:$0xf] }
  0xf0   :  { %577 = vmatmul.bf16.gmra.mxu3 %v465_v16 }
  0xf4   :  { %v1124_v26 = vpop.xlane.xlu1 %374 }
 0x123   :  { %v1122_v25 = vpop.xlane.xlu0 %310 }
 0x129   :  { %v1126_v27 = vpop.xlane.xlu2 %326 }
 0x12a   :  { %v398_v28 = vsub.f32 %v1126_v27, %v1124_v26 }
 0x12b   :  { %v1130_v29 = vpop.xlane.xlu0 %312 }
 0x133   :  { %v1132_v30 = vpop.xlane.xlu0 %328 }
 0x134   :  { %v399_v31 = vsub.f32 %v1132_v30, %v1116_v56  ;;  %v1136_v32 = vpop.xlane.xlu1 %314 }
 0x137   :  { %v543_v34 = vpop.f32.mrf.mxu1 }
 0x138   :  { %v544_v35 = vadd.f32 %v1141_v33, %v543_v34  ;;  %v108_v34 = vunpack.c.l.bf16 %v92_v14 }
 0x13a   :  { %v583_v37 = vmax.f32 %v544_v35, 0.0 }
 0x13c   :  { %v1149_v38 = vpop.xlane.xlu1 %330  ;;  %v603_v39 = vmul.f32 %v1147_v36, %v583_v37 }
 0x13d   :  { %v400_v40 = vsub.f32 %v1149_v38, %v1120_v24 }
 0x13e   :  { %619 = vadd.xlane.f32.xlu2 %v603_v39 }
 0x13f   :  { %v545_v41 = vpop.f32.mrf.mxu1 }
 0x140   :  { %v546_v42 = vadd.f32 %v1141_v33, %v545_v41  ;;  %v353_v41 = vmul.f32 %v108_v34, %v108_v34  ;;  %v390_v34 = vsub.f32 %v1122_v25, %v1106_v19 }
 0x142   :  { %v584_v43 = vmax.f32 %v546_v42, 0.0 }
 0x143   :  { %v563_v44 = vpop.f32.mrf.mxu3 }
 0x144   :  { %v564_v45 = vadd.f32 %v1141_v33, %v563_v44  ;;  %v604_v46 = vmul.f32 %v1147_v36, %v584_v43  ;;  %v317_v14 = vpop.xlane.xlu1 %316 }
 0x146   :  { %v591_v47 = vmax.f32 %v564_v45, 0.0  ;;  %621 = vadd.xlane.f32.xlu0 %v604_v46 }
 0x147   :  { %v548_v48 = vpop.f32.mrf.mxu1 }
 0x148   :  { %v549_v49 = vadd.f32 %v1141_v33, %v548_v48  ;;  %v611_v50 = vmul.f32 %v1147_v36, %v591_v47 }
 0x14a   :  { %635 = vadd.xlane.f32.xlu1 %v611_v50  ;;  %v585_v52 = vmax.f32 %v549_v49, 0.0 }
 0x14b   :  { %v565_v51 = vpop.f32.mrf.mxu3 }
 0x14c   :  { %v566_v54 = vadd.f32 %v1141_v33, %v565_v51  ;;  %v605_v60 = vmul.f32 %v1147_v36, %v585_v52  ;;  %v96_v52 = vld [vmem:[#allocation3 + $0x38] sm:$0xff]  }
 0x14e   :  { %v592_v55 = vmax.f32 %v566_v54, 0.0 }
 0x14f   :  { %v550_v57 = vpop.f32.mrf.mxu1 }
 0x150   :  { %v551_v58 = vadd.f32 %v1141_v33, %v550_v57  ;;  %v612_v59 = vmul.f32 %v1147_v36, %v592_v55 }
 0x152   :  { %v586_v61 = vmax.f32 %v551_v58, 0.0  ;;  %637 = vadd.xlane.f32.xlu0 %v612_v59  ;;  %623 = vadd.xlane.f32.xlu1 %v605_v60  ;;  %v110_v58 = vunpack.c.h.bf16 %v93_v7  ;;  %v112_v59 = vunpack.c.h.bf16 %v96_v52  ;;  %v111_v60 = vunpack.c.l.bf16 %v96_v52 }
 0x153   :  { %v568_v62 = vpop.f32.mrf.mxu3 }
 0x154   :  { %v606_v63 = vmul.f32 %v1147_v36, %v586_v61  ;;  %v569_v0 = vadd.f32 %v1141_v33, %v568_v62  ;;  %v355_v61 = vmul.f32 %v110_v58, %v110_v58  ;;  %v357_v62 = vmul.f32 %v112_v59, %v112_v59 }
 0x156   :  { %625 = vadd.xlane.f32.xlu2 %v606_v63  ;;  %v593_v1 = vmax.f32 %v569_v0, 0.0  ;;  %v356_v63 = vmul.f32 %v111_v60, %v111_v60 }
 0x157   :  { %v553_v2 = vpop.f32.mrf.mxu1 }
 0x158   :  { %v554_v3 = vadd.f32 %v1141_v33, %v553_v2  ;;  %v613_v5 = vmul.f32 %v1147_v36, %v593_v1 }
 0x15a   :  { %v587_v4 = vmax.f32 %v554_v3, 0.0 }
 0x15b   :  { %v570_v6 = vpop.f32.mrf.mxu3 }
 0x15c   :  { %v607_v8 = vmul.f32 %v1147_v36, %v587_v4  ;;  %v571_v45 = vadd.f32 %v1141_v33, %v570_v6 }
 0x15e   :  { %639 = vadd.xlane.f32.xlu2 %v613_v5  ;;  %627 = vadd.xlane.f32.xlu0 %v607_v8  ;;  %v594_v49 = vmax.f32 %v571_v45, 0.0 }
 0x15f   :  { %v555_v10 = vpop.f32.mrf.mxu1 }
 0x160   :  { %v556_v11 = vadd.f32 %v1141_v33, %v555_v10  ;;  %v614_v55 = vmul.f32 %v1147_v36, %v594_v49  ;;  %v1184_v10 = vpop.xlane.xlu2 %332  ;;  %v393_v49 = vsub.f32 %v317_v14, %v1112_v22 }
 0x162   :  { %v588_v12 = vmax.f32 %v556_v11, 0.0  ;;  %v409_v52 = vmul.f32 0.5, %v393_v49 }
 0x163   :  { %v573_v15 = vpop.f32.mrf.mxu3 }
 0x164   :  { %v608_v16 = vmul.f32 %v1147_v36, %v588_v12  ;;  %v574_v42 = vadd.f32 %v1141_v33, %v573_v15  ;;  %v1186_v12 = vpop.xlane.xlu0 %334 }
 0x166   :  { %382 = vadd.xlane.f32.xlu0 %v354_v13  ;;  %629 = vadd.xlane.f32.xlu1 %v608_v16  ;;  %v595_v46 = vmax.f32 %v574_v42, 0.0 }
 0x167   :  { %v558_v35 = vpop.f32.mrf.mxu1 }
 0x168   :  { %v559_v37 = vadd.f32 %v1141_v33, %v558_v35  ;;  %v615_v51 = vmul.f32 %v1147_v36, %v595_v46  ;;  %v319_v11 = vpop.xlane.xlu2 %318  ;;  %v406_v35 = vmul.f32 0.5, %v390_v34 }
 0x16a   :  { %v589_v39 = vmax.f32 %v559_v37, 0.0 }
 0x16b   :  { %v575_v43 = vpop.f32.mrf.mxu3 }
 0x16c   :  { %v609_v44 = vmul.f32 %v1147_v36, %v589_v39  ;;  %v576_v1 = vadd.f32 %v1141_v33, %v575_v43  ;;  %v323_v15 = vpop.xlane.xlu0 %322 }
 0x16d   :  { %v396_v22 = vsub.f32 %v323_v15, %v1118_v53  ;;  %v415_v53 = vmul.f32 0.5, %v399_v31 }
 0x16e   :  { %631 = vadd.xlane.f32.xlu0 %v609_v44  ;;  %380 = vadd.xlane.f32.xlu1 %v353_v41  ;;  %v596_v4 = vmax.f32 %v576_v1, 0.0  ;;  %v391_v41 = vsub.f32 %v1130_v29, %v1102_v17  ;;  %v394_v29 = vsub.f32 %v319_v11, %v1108_v20 }
 0x16f   :  { %v560_v47 = vpop.f32.mrf.mxu1 }
 0x170   :  { %v561_v48 = vadd.f32 %v1141_v33, %v560_v47  ;;  %v616_v7 = vmul.f32 %v1147_v36, %v596_v4  ;;  %v321_v13 = vpop.xlane.xlu2 %320  ;;  %v407_v43 = vmul.f32 0.5, %v391_v41  ;;  %v392_v47 = vsub.f32 %v1136_v32, %v1104_v18 }
 0x171   :  { %v395_v58 = vsub.f32 %v321_v13, %v1110_v21  ;;  %v414_v21 = vmul.f32 0.5, %v398_v28 }
 0x172   :  { %v590_v50 = vmax.f32 %v561_v48, 0.0  ;;  %v408_v48 = vmul.f32 0.5, %v392_v47 }
 0x173   :  { %v578_v57 = vpop.f32.mrf.mxu3  ;;  %v411_v59 = vmul.f32 0.5, %v395_v58 }
 0x174   :  { %v610_v54 = vmul.f32 %v1147_v36, %v590_v50  ;;  %v579_v0 = vadd.f32 %v1141_v33, %v578_v57  ;;  %v1194_v37 = vpop.xlane.xlu0 %340 }
 0x176   :  { %633 = vadd.xlane.f32.xlu2 %v610_v54  ;;  %643 = vadd.xlane.f32.xlu0 %v615_v51  ;;  %v597_v2 = vmax.f32 %v579_v0, 0.0 }
 0x177   :  { %641 = vadd.xlane.f32.xlu1 %v614_v55  ;;  %v410_v55 = vmul.f32 0.5, %v394_v29 }
 0x178   :  { %v617_v6 = vmul.f32 %v1147_v36, %v597_v2  ;;  %v1188_v16 = vpop.xlane.xlu2 %338 }
 0x17b   :  { %v580_v3 = vpop.f32.mrf.mxu3 }
 0x17c   :  { %v581_v5 = vadd.f32 %v1141_v33, %v580_v3  ;;  %v1190_v33 = vpop.xlane.xlu1 %336 }
 0x17e   :  { %384 = vadd.xlane.f32.xlu2 %v355_v61  ;;  %388 = vadd.xlane.f32.xlu0 %v357_v62  ;;  %v598_v8 = vmax.f32 %v581_v5, 0.0 }
 0x17f   :  { %386 = vadd.xlane.f32.xlu1 %v356_v63  ;;  %v412_v63 = vmul.f32 0.5, %v396_v22 }
 0x180   :  { %v618_v9 = vmul.f32 %v1147_v36, %v598_v8 }
 0x184   :  { %v325_v42 = vpop.xlane.xlu1 %324 }
 0x185   :  { %v397_v20 = vsub.f32 %v325_v42, %v1114_v23  ;;  %v416_v23 = vmul.f32 0.5, %v400_v40 }
 0x186   :  { %645 = vadd.xlane.f32.xlu2 %v616_v7 }
 0x187   :  { %647 = vadd.xlane.f32.xlu1 %v617_v6  ;;  %v413_v2 = vmul.f32 0.5, %v397_v20 }
 0x18e   :  { %649 = vadd.xlane.f32.xlu2 %v618_v9 }
 0x1b1   :  { %v620_v36 = vpop.xlane.xlu2 %619 }
 0x1b2   :  { %v651_v39 = vadd.f32 %v620_v36, %v406_v35 }
 0x1b4   :  { %667 = vxpose.xlu0.b32.start [1/16] (narrow) %v651_v39, 8 }
 0x1b9   :  { %v622_v44 = vpop.xlane.xlu0 %621 }
 0x1ba   :  { %v652_v45 = vadd.f32 %v622_v44, %v407_v43 }
 0x1bc   :  { %668 = vxpose.xlu0.b32.cont [2/16] (narrow) %v652_v45, 8 }
 0x1bd   :  { %v636_v46 = vpop.xlane.xlu1 %635 }
 0x1be   :  { %v659_v4 = vadd.f32 %v636_v46, %v414_v21 }
 0x1c5   :  { %v624_v19 = vpop.xlane.xlu1 %623  ;;  %v638_v50 = vpop.xlane.xlu0 %637 }
 0x1c6   :  { %v653_v25 = vadd.f32 %v624_v19, %v408_v48  ;;  %v660_v5 = vadd.f32 %v638_v50, %v415_v53 }
 0x1c8   :  { %669 = vxpose.xlu0.b32.cont [3/16] (narrow) %v653_v25, 8 }
 0x1c9   :  { %v626_v51 = vpop.xlane.xlu2 %625 }
 0x1ca   :  { %v654_v17 = vadd.f32 %v626_v51, %v409_v52 }
 0x1d0   :  { %670 = vxpose.xlu0.b32.cont [4/16] (narrow) %v654_v17, 8 }
 0x1d1   :  { %v628_v54 = vpop.xlane.xlu0 %627  ;;  %v640_v61 = vpop.xlane.xlu2 %639 }
 0x1d2   :  { %v655_v57 = vadd.f32 %v628_v54, %v410_v55  ;;  %v661_v7 = vadd.f32 %v640_v61, %v416_v23 }
 0x1d8   :  { %671 = vxpose.xlu0.b32.cont [5/16] (narrow) %v655_v57, 8 }
 0x1d9   :  { %v383_v18 = vpop.xlane.xlu0 %382  ;;  %v630_v32 = vpop.xlane.xlu1 %629 }
 0x1da   :  { %v656_v60 = vadd.f32 %v630_v32, %v411_v59  ;;  %v402_v28 = vsub.f32 %v1186_v12, %v383_v18 }
 0x1dc   :  { %v418_v30 = vmul.f32 0.5, %v402_v28 }
 0x1e0   :  { %672 = vxpose.xlu0.b32.cont [6/16] (narrow) %v656_v60, 8 }
 0x1e1   :  { %v632_v62 = vpop.xlane.xlu0 %631  ;;  %v381_v6 = vpop.xlane.xlu1 %380 }
 0x1e2   :  { %v657_v0 = vadd.f32 %v632_v62, %v412_v63  ;;  %v401_v8 = vsub.f32 %v1184_v10, %v381_v6 }
 0x1e4   :  { %v417_v26 = vmul.f32 0.5, %v401_v8 }
 0x1e8   :  { %673 = vxpose.xlu0.b32.cont [7/16] (narrow) %v657_v0, 8 }
 0x1e9   :  { %v634_v1 = vpop.xlane.xlu2 %633  ;;  %v644_v56 = vpop.xlane.xlu0 %643 }
 0x1ea   :  { %v658_v3 = vadd.f32 %v634_v1, %v413_v2  ;;  %v642_v9 = vpop.xlane.xlu1 %641  ;;  %v663_v31 = vadd.f32 %v644_v56, %v418_v30 }
 0x1eb   :  { %v662_v27 = vadd.f32 %v642_v9, %v417_v26 }
 0x1f0   :  { %674 = vxpose.xlu0.b32.cont [8/16] (narrow) %v658_v3, 8 }
 0x1f1   :  { %v385_v11 = vpop.xlane.xlu2 %384  ;;  %v389_v35 = vpop.xlane.xlu0 %388 }
 0x1f2   :  { %v403_v13 = vsub.f32 %v1190_v33, %v385_v11  ;;  %v387_v14 = vpop.xlane.xlu1 %386  ;;  %v405_v12 = vsub.f32 %v1194_v37, %v389_v35  ;;  %v699_v33 = vld [vmem:[%s1228_s0] sm:$0x1]  ;;  %s1000_s0 = smov [#allocation9]  }
 0x1f3   :  { %v404_v10 = vsub.f32 %v1188_v16, %v387_v14  ;;  %v702_v16 = vstv %s1236_s8  ;;  %s729_s10 = sshll.u32 %s1000_s0, 4  ;;  %s731_s8 = sshll.u32 %s1237_s9, 4  ;;  %s730_s10 = int_to_ptr.vmem [resolvable:$true] %s729_s10  ;;  %s732_s8 = int_to_ptr.hbm [resolvable:$true] %s731_s8 }
 0x1f4   :  { %v419_v38 = vmul.f32 0.5, %v403_v13  ;;  %v421_v41 = vmul.f32 0.5, %v405_v12 }
 0x1f5   :  { %v420_v34 = vmul.f32 0.5, %v404_v10 }
 0x1f8   :  { %675 = vxpose.xlu0.b32.cont [9/16] (narrow) %v659_v4, 8 }
 0x1f9   :  { %v646_v24 = vpop.xlane.xlu2 %645 }
 0x1fa   :  { %v664_v40 = vadd.f32 %v646_v24, %v419_v38  ;;  %v648_v15 = vpop.xlane.xlu1 %647 }
 0x1fb   :  { %v665_v36 = vadd.f32 %v648_v15, %v420_v34 }
 0x200   :  { %676 = vxpose.xlu0.b32.cont [10/16] (narrow) %v660_v5, 8 }
 0x201   :  { %v650_v39 = vpop.xlane.xlu2 %649 }
 0x202   :  { %v666_v42 = vadd.f32 %v650_v39, %v421_v41 }
 0x208   :  { %677 = vxpose.xlu0.b32.cont [11/16] (narrow) %v661_v7, 8 }
 0x210   :  { %678 = vxpose.xlu0.b32.cont [12/16] (narrow) %v662_v27, 8 }
 0x218   :  { %679 = vxpose.xlu0.b32.cont [13/16] (narrow) %v663_v31, 8 }
 0x220   :  { %680 = vxpose.xlu0.b32.cont [14/16] (narrow) %v664_v40, 8 }
 0x228   :  { %681 = vxpose.xlu0.b32.cont [15/16] (narrow) %v665_v36, 8 }
 0x230   :  { %682 = vxpose.xlu0.b32.end [16/16] (narrow) %v666_v42, 8 }
 0x25c   :  { %v683_v43 = vpop.trf.xlu0 }
 0x25d   :  { %v700_v44 = vadd.f32 %v699_v33, %v683_v43 }
 0x25f   :  { %v703_v45 = vadd.f32 %v702_v16, %v700_v44 }
 0x261   :  { %v838_v46 = vmul.f32 -1.442695, %v703_v45 }
 0x263   :  { %889 = vpow2.f32 %v838_v46 }
 0x269   :  { %v890_v47 = vpop.eup %889 }
 0x26a   :  { %v707_v37 = vadd.f32 1.0, %v890_v47 }
 0x26c   :  { %891 = vrcp.f32 %v707_v37  ;;  %v719_v49 = vand.u32 2147483648, %v707_v37  ;;  %v717_v51 = vand.u32 2147483647, %v707_v37  ;;  %vm713_vm1 = vweird.f32 %v707_v37 }
 0x26e   :  { %v720_v17 = vor.u32 1.1754944e-38, %v719_v49  ;;  %vm718_vm3 = vcmp.eq.f32.partialorder %v717_v51, 8.507059e+37 }
 0x272   :  { %v892_v48 = vpop.eup %891 }
 0x273   :  { %v709_v19 = vmul.f32 %v892_v48, %v707_v37  ;;  %vm714_vm0 = vweird.f32 %v892_v48 }
 0x274   :  { %vm715_vm2 = vmor %vm713_vm1, %vm714_vm0 }
 0x275   :  { %v710_v25 = vsub.f32 1.0, %v709_v19 }
 0x277   :  { %v711_v50 = vmul.f32 %v892_v48, %v710_v25 }
 0x279   :  { %v712_v52 = vadd.f32 %v892_v48, %v711_v50 }
 0x27b   :  { %v716_v29 = vsel %vm715_vm2, %v892_v48, %v712_v52 }
 0x27c   :  { %v721_v54 = vsel %vm718_vm3, %v720_v17, %v716_v29 }
 0x27d   :  { %723 = vst [vmem:[#allocation9] sm:$0x1] %v721_v54 }
 0x27e   :  { %734 = dma.vmem_to_hbm [thread:$0]  %s730_s10, 16, %s732_s8, [#allocation5]  }
 0x27f   :  { %993 = dma.done.wait [#allocation5], 16  }
 0x280   :  { %994 = vsyncadd [#allocation5], 4294967280 }
 0x281   :  { %739 = vsyncpa [#allocation4], 1 }
 0x282   :  { %740 = vsyncpa [#allocation7], 1 }
 0x283   :  { %741 = vsyncpa [#allocation5], 1 }

</bundles_post_ra>
